<compile_context>
chip_gen: v6e
topology: v6e:2x2x1
jax: 0.10.0
libtpu: 0.0.40
codegen_flags: <defaults>
</compile_context>

<pallas_src>
import functools

import jax
import jax.numpy as jnp
from jax.experimental import pallas as pl
from jax.experimental.pallas import tpu as pltpu

EPS = 1e-5


def _vmem_capacity_bytes():
    try:
        cap = getattr(pltpu.get_tpu_info(), "vmem_capacity_bytes", None)
        if cap:
            return int(cap)
    except Exception:
        pass
    return 64 * 1024 * 1024  # conservative default (v7x per-TC VMEM)


def _choose_tile_b(B, E, itemsize, block_b, vmem_cap):
    """Batch-tile size: multiple of 128 when B >= 128, never larger than the array."""
    if block_b is None:
        w_bytes = 2 * E * E * itemsize                       # resident W, default 2 buffers
        x_budget = max(4 * 1024 * 1024, int(0.55 * vmem_cap) - w_bytes)
        block_b = max(128, x_budget // (4 * E * itemsize))   # 2 inputs x 2 pipeline buffers
    desired = max(1, int(block_b))
    if B >= 128:
        t = min(desired, B)
        t = max(128, (t // 128) * 128)
        return min(t, (B // 128) * 128)
    if B >= 8:
        t = min(desired, B)
        t = max(8, (t // 8) * 8)
        return min(t, (B // 8) * 8)
    return B


def _bilinear_logits_kernel(bias_ref, x1_ref, x2_ref, w_ref, logits_ref, psum_ref, *, valid_b):
    # bias_ref: (1,) f32 SMEM. x1/x2: (tile_b, E) VMEM tiles. w_ref: (E, E) resident.
    # logits_ref: (1, tile_b) f32 (lane-dense). psum_ref: (1, 128) f32, [sum t, sum t^2, 0...].
    i = pl.program_id(0)
    tile_b = logits_ref.shape[1]

    # Bilinear logit for this batch tile: MXU matmul + VPU multiply + XLU lane-reduce.
    xw = jnp.dot(x1_ref[...], w_ref[...], preferred_element_type=jnp.float32)
    t = jnp.sum(xw * x2_ref[...].astype(jnp.float32), axis=-1) + bias_ref[0]   # (tile_b,)
    t2 = t[None, :].astype(jnp.float32)                                        # (1, tile_b)
    logits_ref[...] = t2

    # Per-tile partial sums for the BatchNorm batch statistics. The ragged tail tile
    # (rows past B are OOB-padded garbage) is masked so it never pollutes the stats.
    col = jax.lax.broadcasted_iota(jnp.int32, (1, tile_b), 1)
    limit = valid_b - i * tile_b
    tm = jnp.where(col < limit, t2, 0.0)
    lane = jax.lax.broadcasted_iota(jnp.int32, (1, 128), 1)
    psum_ref[...] = (jnp.where(lane == 0, jnp.sum(tm), 0.0)
                     + jnp.where(lane == 1, jnp.sum(tm * tm), 0.0))


def _bn_sigmoid_kernel(params_ref, t_ref, o_ref):
    # params_ref: (3,) f32 SMEM = [mean, scale (= gamma * rsqrt(var + eps)), beta]
    y = (t_ref[...] - params_ref[0]) * params_ref[1] + params_ref[2]
    o_ref[...] = 1.0 / (1.0 + jnp.exp(-y))


def saliency_prediction(resource_embed, template_embed, weight, bias, gamma, beta, *, block_b=None):
    """resource_embed, template_embed: (B, E); weight: (E, E); bias/gamma/beta: (1,).

    Returns (B, 1) float32 (matches the PyTorch module's output shape).
    """
    B, E = resource_embed.shape
    assert template_embed.shape == (B, E)
    assert weight.shape == (E, E)

    x1 = resource_embed
    x2 = template_embed.astype(x1.dtype)   # streams keep the producer's dtype (no extra HBM pass)
    w = weight.astype(x1.dtype)            # tiny resident operand; cast is negligible
    itemsize = jnp.dtype(x1.dtype).itemsize

    vmem_cap = _vmem_capacity_bytes()
    tile_b = _choose_tile_b(B, E, itemsize, block_b, vmem_cap)
    num_tiles = int(pl.cdiv(B, tile_b))

    est = (4 * tile_b * E * itemsize        # x1/x2 tiles: 2 inputs x 2 pipeline buffers
           + 2 * E * E * itemsize           # resident W (default double-buffered)
           + 2 * tile_b * 4 + 2 * 128 * 4   # logit + partial output blocks
           + 2 * 1024 * 1024)               # compiler scratch slack
    vmem_limit = int(max(est, 16 * 1024 * 1024))
    if vmem_limit > int(0.95 * vmem_cap):
        raise ValueError(
            f"saliency_prediction: tile needs ~{est} bytes of VMEM which exceeds the "
            f"~{vmem_cap}-byte capacity; pass a smaller block_b.")

    bias_smem = bias.reshape(-1).astype(jnp.float32)

    # ---- Pass 1: bilinear logits + per-tile BN partial sums (parallel over batch tiles).
    logits, psums = pl.pallas_call(
        functools.partial(_bilinear_logits_kernel, valid_b=B),
        out_shape=(jax.ShapeDtypeStruct((num_tiles, tile_b), jnp.float32),
                   jax.ShapeDtypeStruct((num_tiles, 128), jnp.float32)),
        grid_spec=pl.GridSpec(
            grid=(num_tiles,),
            in_specs=[
                pl.BlockSpec(memory_space=pltpu.SMEM),          # bias
                pl.BlockSpec((tile_b, E), lambda i: (i, 0)),     # x1 batch tile
                pl.BlockSpec((tile_b, E), lambda i: (i, 0)),     # x2 batch tile
                pl.BlockSpec((E, E), lambda i: (0, 0)),          # W, resident
            ],
            out_specs=[
                pl.BlockSpec((1, tile_b), lambda i: (i, 0)),     # logits (lane-dense tile)
                pl.BlockSpec((1, 128), lambda i: (i, 0)),        # per-tile [sum, sumsq]
            ],
        ),
        compiler_params=pltpu.CompilerParams(
            dimension_semantics=("parallel",),                   # no cross-tile state
            vmem_limit_bytes=vmem_limit,
        ),
    )(bias_smem, x1, x2, w)

    # ---- Tiny scalar math between passes (num_tiles*2 floats -> 3 scalars).
    col_sums = jnp.sum(psums, axis=0)
    inv_n = jnp.float32(1.0 / B)
    mean = col_sums[0] * inv_n
    # E[t^2] - mean^2 in f32; clamp guards against tiny negative rounding.
    var = jnp.maximum(col_sums[1] * inv_n - mean * mean, 0.0)
    scale = gamma.reshape(()).astype(jnp.float32) * jax.lax.rsqrt(var + EPS)
    params = jnp.stack([mean, scale, beta.reshape(()).astype(jnp.float32)])

    # ---- Pass 2: elementwise BatchNorm affine + sigmoid (parallel over batch tiles).
    out2d = pl.pallas_call(
        _bn_sigmoid_kernel,
        out_shape=jax.ShapeDtypeStruct((num_tiles, tile_b), jnp.float32),
        grid_spec=pl.GridSpec(
            grid=(num_tiles,),
            in_specs=[
                pl.BlockSpec(memory_space=pltpu.SMEM),
                pl.BlockSpec((1, tile_b), lambda i: (i, 0)),
            ],
            out_specs=pl.BlockSpec((1, tile_b), lambda i: (i, 0)),
        ),
        compiler_params=pltpu.CompilerParams(dimension_semantics=("parallel",)),
    )(params, logits)

    # (num_tiles, tile_b) row-major == global batch order; padded tail is dropped.
    return out2d.reshape(-1)[:B].reshape(B, 1)


def _reference(x1, x2, w, bias, gamma, beta):
    t = jnp.einsum("be,ef,bf->b", x1, w, x2)[:, None] + bias[0]
    mean = jnp.mean(t)
    var = jnp.mean((t - mean) ** 2)
    y = (t - mean) / jnp.sqrt(var + EPS) * gamma[0] + beta[0]
    return jax.nn.sigmoid(y)


if __name__ == "__main__":
    key = jax.random.PRNGKey(0)
    k1, k2, k3, k4 = jax.random.split(key, 4)

    B, E = 8, 32  # small batch / embedding_size
    resource_embed = jax.random.normal(k1, (B, E), dtype=jnp.float32)
    template_embed = jax.random.normal(k2, (B, E), dtype=jnp.float32)

    # nn.Bilinear(E, E, 1): weight (1, E, E) ~ U(-1/sqrt(E), 1/sqrt(E)), bias (1,)
    bound = 1.0 / float(jnp.sqrt(jnp.float32(E)))
    weight = jax.random.uniform(k3, (E, E), jnp.float32, -bound, bound)
    bias = jax.random.uniform(k4, (1,), jnp.float32, -bound, bound)

    # nn.BatchNorm1d(1) affine params (default init).
    gamma = jnp.ones((1,), jnp.float32)
    beta = jnp.zeros((1,), jnp.float32)

    # 1) Base small-batch shape (single tile).
    out = jax.block_until_ready(
        saliency_prediction(resource_embed, template_embed, weight, bias, gamma, beta))
    assert out.shape == (B, 1)
    ref = _reference(resource_embed, template_embed, weight, bias, gamma, beta)
    assert jnp.allclose(out, ref, atol=1e-4, rtol=1e-4)

    # 2) Multi-tile ragged batch (no wrapper padding): B=300, tile_b=128 -> 3 tiles.
    B2 = 300
    kk1, kk2 = jax.random.split(jax.random.PRNGKey(1))
    r2 = jax.random.normal(kk1, (B2, E), dtype=jnp.float32)
    t2 = jax.random.normal(kk2, (B2, E), dtype=jnp.float32)
    out2 = jax.block_until_ready(
        saliency_prediction(r2, t2, weight, bias, gamma, beta, block_b=128))
    ref2 = _reference(r2, t2, weight, bias, gamma, beta)
    assert out2.shape == (B2, 1)
    assert jnp.allclose(out2, ref2, atol=1e-4, rtol=1e-4)

    # 2b) Default VMEM-budget tile derivation (tile_b=256 here, heavier tail masking).
    out2b = jax.block_until_ready(
        saliency_prediction(r2, t2, weight, bias, gamma, beta))
    assert jnp.allclose(out2b, ref2, atol=1e-4, rtol=1e-4)

    # 3) bf16 producer path: inputs already live as bf16 (no wrapper-side cast of f32 data).
    out3 = jax.block_until_ready(
        saliency_prediction(r2.astype(jnp.bfloat16), t2.astype(jnp.bfloat16),
                            weight, bias, gamma, beta, block_b=128))
    assert jnp.allclose(out3, ref2, atol=5e-2, rtol=5e-2)

    print("KERNEL_OK")
</pallas_src>

<mosaic_0001>
module attributes {stable_mosaic.version = 11 : i64} {
  func.func @_bilinear_logits_kernel(%arg0: i32, %arg1: memref<1xf32, #tpu.memory_space<smem>>, %arg2: memref<8x32xf32, #tpu.memory_space<vmem>>, %arg3: memref<8x32xf32, #tpu.memory_space<vmem>>, %arg4: memref<32x32xf32, #tpu.memory_space<vmem>>, %arg5: memref<1x8xf32, #tpu.memory_space<vmem>>, %arg6: memref<1x128xf32, #tpu.memory_space<vmem>>) attributes {dimension_semantics = [#tpu.dimension_semantics<parallel>], iteration_bounds = array<i64: 1>, scalar_prefetch = 0 : i64, scratch_operands = 0 : i64, tpu.core_type = #tpu.core_type<tc>, window_params = [{transform_indices = @transform_0, window_bounds = array<i64: 1>}, {transform_indices = @transform_1, window_bounds = array<i64: 8, 32>}, {transform_indices = @transform_2, window_bounds = array<i64: 8, 32>}, {pipeline_mode = #tpu.pipeline_mode<synchronous>, transform_indices = @transform_3, window_bounds = array<i64: 32, 32>}, {transform_indices = @transform_4, window_bounds = array<i64: 1, 8>}, {transform_indices = @transform_5, window_bounds = array<i64: 1, 128>}]} {
    %c0 = arith.constant 0 : index
    %c0_0 = arith.constant 0 : index
    %0 = vector.load %arg2[%c0, %c0_0] : memref<8x32xf32, #tpu.memory_space<vmem>>, vector<8x32xf32>
    %c0_1 = arith.constant 0 : index
    %c0_2 = arith.constant 0 : index
    %1 = vector.load %arg4[%c0_1, %c0_2] : memref<32x32xf32, #tpu.memory_space<vmem>>, vector<32x32xf32>
    %cst = arith.constant dense<0.000000e+00> : vector<8x32xf32>
    %2 = tpu.matmul %0, %1, %cst {dimension_numbers = #tpu.dot_dimension_numbers<[1], [0], [0], [1], [0, 0, 1, 1], [], []>} : vector<8x32xf32>, vector<32x32xf32>, vector<8x32xf32> -> vector<8x32xf32>
    %c0_3 = arith.constant 0 : index
    %c0_4 = arith.constant 0 : index
    %3 = vector.load %arg3[%c0_3, %c0_4] : memref<8x32xf32, #tpu.memory_space<vmem>>, vector<8x32xf32>
    %4 = arith.mulf %2, %3 : vector<8x32xf32>
    %cst_5 = arith.constant dense<0.000000e+00> : vector<8xf32>
    %5 = vector.multi_reduction <add>, %4, %cst_5 [1] : vector<8x32xf32> to vector<8xf32>
    %c0_6 = arith.constant 0 : index
    %6 = memref.load %arg1[%c0_6] : memref<1xf32, #tpu.memory_space<smem>>
    %7 = vector.broadcast %6 : f32 to vector<8xf32>
    %8 = arith.addf %5, %7 : vector<8xf32>
    %9 = vector.shape_cast %8 : vector<8xf32> to vector<1x8xf32>
    %c0_7 = arith.constant 0 : index
    %c0_8 = arith.constant 0 : index
    %10 = vector.load %arg5[%c0_7, %c0_8] : memref<1x8xf32, #tpu.memory_space<vmem>>, vector<1x8xf32>
    tpu.vector_store %arg5[%c0_7, %c0_8], %9 {strides = array<i32>} : memref<1x8xf32, #tpu.memory_space<vmem>>, vector<1x8xf32>,
    %11 = tpu.iota {dimensions = array<i32: 1>} : vector<1x8xi32>
    %c8_i32 = arith.constant 8 : i32
    %12 = arith.muli %arg0, %c8_i32 : i32
    %c8_i32_9 = arith.constant 8 : i32
    %13 = arith.subi %c8_i32_9, %12 : i32
    %14 = vector.broadcast %13 : i32 to vector<1x8xi32>
    %15 = arith.cmpi slt, %11, %14 : vector<1x8xi32>
    %cst_10 = arith.constant 0.000000e+00 : f32
    %16 = vector.broadcast %cst_10 : f32 to vector<1x8xf32>
    %17 = arith.select %15, %9, %16 : vector<1x8xi1>, vector<1x8xf32>
    %18 = tpu.iota {dimensions = array<i32: 1>} : vector<1x128xi32>
    %c0_i32 = arith.constant 0 : i32
    %19 = vector.broadcast %c0_i32 : i32 to vector<1x128xi32>
    %20 = arith.cmpi eq, %18, %19 : vector<1x128xi32>
    %21 = vector.shape_cast %17 : vector<1x8xf32> to vector<1x1x8xf32>
    %cst_11 = arith.constant dense<0.000000e+00> : vector<1xf32>
    %22 = vector.multi_reduction <add>, %21, %cst_11 [1, 2] : vector<1x1x8xf32> to vector<1xf32>
    %23 = vector.shape_cast %22 : vector<1xf32> to vector<1x1x1xf32>
    %24 = vector.extract %23[0, 0, 0] : f32 from vector<1x1x1xf32>
    %cst_12 = arith.constant 0.000000e+00 : f32
    %25 = vector.broadcast %24 : f32 to vector<1x128xf32>
    %26 = vector.broadcast %cst_12 : f32 to vector<1x128xf32>
    %27 = arith.select %20, %25, %26 : vector<1x128xi1>, vector<1x128xf32>
    %c1_i32 = arith.constant 1 : i32
    %28 = vector.broadcast %c1_i32 : i32 to vector<1x128xi32>
    %29 = arith.cmpi eq, %18, %28 : vector<1x128xi32>
    %30 = arith.mulf %17, %17 : vector<1x8xf32>
    %31 = vector.shape_cast %30 : vector<1x8xf32> to vector<1x1x8xf32>
    %cst_13 = arith.constant dense<0.000000e+00> : vector<1xf32>
    %32 = vector.multi_reduction <add>, %31, %cst_13 [1, 2] : vector<1x1x8xf32> to vector<1xf32>
    %33 = vector.shape_cast %32 : vector<1xf32> to vector<1x1x1xf32>
    %34 = vector.extract %33[0, 0, 0] : f32 from vector<1x1x1xf32>
    %cst_14 = arith.constant 0.000000e+00 : f32
    %35 = vector.broadcast %34 : f32 to vector<1x128xf32>
    %36 = vector.broadcast %cst_14 : f32 to vector<1x128xf32>
    %37 = arith.select %29, %35, %36 : vector<1x128xi1>, vector<1x128xf32>
    %38 = arith.addf %27, %37 : vector<1x128xf32>
    %c0_15 = arith.constant 0 : index
    %c0_16 = arith.constant 0 : index
    %39 = vector.load %arg6[%c0_15, %c0_16] : memref<1x128xf32, #tpu.memory_space<vmem>>, vector<1x128xf32>
    tpu.vector_store %arg6[%c0_15, %c0_16], %38 {strides = array<i32>} : memref<1x128xf32, #tpu.memory_space<vmem>>, vector<1x128xf32>,
    return
  }
  func.func @transform_0(%arg0: i32) -> i32 {
    %c0_i32 = arith.constant 0 : i32
    %c0_i32_0 = arith.constant 0 : i32
    return %c0_i32 : i32
  }
  func.func @transform_1(%arg0: i32) -> (i32, i32) {
    %c0_i32 = arith.constant 0 : i32
    %c0_i32_0 = arith.constant 0 : i32
    return %arg0, %c0_i32 : i32, i32
  }
  func.func @transform_2(%arg0: i32) -> (i32, i32) {
    %c0_i32 = arith.constant 0 : i32
    %c0_i32_0 = arith.constant 0 : i32
    return %arg0, %c0_i32 : i32, i32
  }
  func.func @transform_3(%arg0: i32) -> (i32, i32) {
    %c0_i32 = arith.constant 0 : i32
    %c0_i32_0 = arith.constant 0 : i32
    %c0_i32_1 = arith.constant 0 : i32
    return %c0_i32, %c0_i32_0 : i32, i32
  }
  func.func @transform_4(%arg0: i32) -> (i32, i32) {
    %c0_i32 = arith.constant 0 : i32
    %c0_i32_0 = arith.constant 0 : i32
    return %arg0, %c0_i32 : i32, i32
  }
  func.func @transform_5(%arg0: i32) -> (i32, i32) {
    %c0_i32 = arith.constant 0 : i32
    %c0_i32_0 = arith.constant 0 : i32
    return %arg0, %c0_i32 : i32, i32
  }
}

</mosaic_0001>

<bundles_post_ra>
// kernel: tpu_custom_call.1
= control target key start
LH: loop header
LB: loop body
LE: loop exit
PB: predicated region body
PF: predicated region fallthrough
CT: control target
= control target key end

     0   :  { %12 = vsyncpa [#allocation4], 0  ;;  %s415_s0 = inlined_call_operand.<no memory space> [shape: f32[1], index: 0, kind: input, shape index: {}]   ;;  %s416_s1 = inlined_call_operand.hbm [shape: f32[8,32], index: 1, kind: input, shape index: {}]   ;;  %s417_s2 = inlined_call_operand.hbm [shape: f32[8,32], index: 2, kind: input, shape index: {}]   ;;  %s418_s3 = inlined_call_operand.hbm [shape: f32[32,32], index: 3, kind: input, shape index: {}]   ;;  %s419_s4 = inlined_call_operand.hbm [shape: f32[1,8], index: 4, kind: output, shape index: {0}]   ;;  %s420_s5 = inlined_call_operand.hbm [shape: f32[1,128], index: 5, kind: output, shape index: {1}]  }
   0x1   :  { %13 = vsyncpa [#allocation7], 0 }
   0x2   :  { %14 = vsyncpa [#allocation5], 0 }
   0x3   :  { %15 = vsyncpa [#allocation11], 0  ;;  %s358_s18 = smov [#allocation6]   ;;  %s359_s20 = smov [#allocation3]  }
   0x4   :  { %s34_s19 = sshll.u32 %s358_s18, 4  ;;  %s24_s21 = sshll.u32 %s359_s20, 4  ;;  %s35_s19 = int_to_ptr.vmem [resolvable:$true] %s34_s19  ;;  %s25_s21 = int_to_ptr.vmem [resolvable:$true] %s24_s21 }
   0x5   :  { %s258_s22 = scalar_lea.vmem %s35_s19, 128  ;;  %p263_p1 = scmp.lt.s32.totalorder %s35_s19, %s35_s19 }
   0x6   :  { %p259_p0 = scmp.ne.s32.totalorder %s35_s19, %s258_s22  ;;  %p264_p2 = scmp.lt.s32.totalorder %s258_s22, %s258_s22 }
   0x8   :  { %p265_p3 = por %p264_p2, %p263_p1 }
   0xa   :  { %p266_p4 = pnand %p265_p3, %p259_p0 }
   0xc   :  { %269 = shalt.err (!%p266_p4)
}
   0xd   :  { %37 = dma.hbm_to_vmem [thread:$0]  %s417_s2, 128, %s35_s19, [#allocation7]  }
   0xe   :  { %s278_s25 = scalar_lea.vmem %s25_s21, 128  ;;  %p283_p6 = scmp.lt.s32.totalorder %s25_s21, %s25_s21 }
   0xf   :  { %p279_p5 = scmp.ne.s32.totalorder %s25_s21, %s278_s25  ;;  %p284_p7 = scmp.lt.s32.totalorder %s278_s25, %s278_s25 }
  0x11   :  { %p285_p8 = por %p284_p7, %p283_p6 }
  0x13   :  { %p286_p9 = pnand %p285_p8, %p279_p5 }
  0x15   :  { %289 = shalt.err (!%p286_p9)
}
  0x16   :  { %27 = dma.hbm_to_vmem [thread:$0]  %s416_s1, 128, %s25_s21, [#allocation4]  }
  0x17   :  { %s360_s28 = smov [#allocation8]  }
  0x18   :  { %s43_s29 = sshll.u32 %s360_s28, 4  ;;  %s44_s29 = int_to_ptr.vmem [resolvable:$true] %s43_s29 }
  0x19   :  { %s298_s30 = scalar_lea.vmem %s44_s29, 512  ;;  %p303_p11 = scmp.lt.s32.totalorder %s44_s29, %s44_s29 }
  0x1a   :  { %p299_p10 = scmp.ne.s32.totalorder %s44_s29, %s298_s30  ;;  %p304_p12 = scmp.lt.s32.totalorder %s298_s30, %s298_s30 }
  0x1c   :  { %p305_p13 = por %p304_p12, %p303_p11 }
  0x1e   :  { %p306_p0 = pnand %p305_p13, %p299_p10 }
  0x20   :  { %309 = shalt.err (!%p306_p0)
}
  0x21   :  { %s361_s2 = smov 128   ;;  %s362_s6 = smov 8  }
  0x22   :  { %49 = dma.hbm_to_vmem [thread:$0]  %s418_s3, 512, %s44_s29, [#allocation7], %s361_s2, %s361_s2, %s362_s6  }
  0x23   :  { %350 = dma.done.wait [#allocation4], 128  }
  0x24   :  { %351 = vsyncadd [#allocation4], 4294967168 }
  0x25   :  { %352 = dma.done.wait [#allocation7], 640  }
  0x26   :  { %353 = vsyncadd [#allocation7], 4294966656  ;;  %v363_v0 = vmov 0.0   ;;  %vm364_vm0 = vmmov 0   ;;  %v63_v1 = vld [vmem:[#allocation8 + $0x18] sm:$0xff]  ;;  %v62_v2 = vld [vmem:[#allocation8 + $0x10] sm:$0xff]  ;;  %v147_v11 = vlaneseq  ;;  %v144_v14 = vstv %s415_s0 }
  0x27   :  { %226 = vmatprep.subr.mxu0 %v363_v0  ;;  %234 = vmatprep.mubr.msk.f32.mxu0 %vm364_vm0, %v363_v0  ;;  %v61_v3 = vld [vmem:[#allocation8 + $0x8] sm:$0xff]  ;;  %v60_v4 = vld [vmem:[#allocation8] sm:$0xff]  ;;  %v59_v5 = vld [vmem:[#allocation3] sm:$0xff]  ;;  %vm64_vm1 = vcmask 261120   ;;  %vm154_vm2 = vcmask 57344   ;;  %s365_s9 = smov [#allocation9]  }
  0x28   :  { %227 = vmatpush3.msra.mxu0 %v63_v1  ;;  %v138_v6 = vld [vmem:[#allocation6] sm:$0xff]  ;;  %v148_v12 = vand.u32 127, %v147_v11  ;;  %v150_v13 = vshrl.u32 %v147_v11, 7  ;;  %s196_s10 = sshll.u32 %s365_s9, 4  ;;  %s197_s10 = int_to_ptr.vmem [resolvable:$true] %s196_s10 }
  0x29   :  { %228 = vmatprep.subr.mxu0 %v363_v0  ;;  %s310_s11 = scalar_lea.vmem %s197_s10, 16  ;;  %s314_s12 = scalar_lea.vmem %s197_s10, 32 }
  0x2a   :  { %229 = vmatpush3.msra.mxu0 %v62_v2  ;;  %v151_v15 = vsub.s32 %v148_v12, %v150_v13  ;;  %vm159_vm3 = vcmp.lt.s32.totalorder %v148_v12, 8  ;;  %p311_p1 = scmp.ne.s32.totalorder %s197_s10, %s310_s11  ;;  %p315_p2 = scmp.lt.s32.totalorder %s197_s10, %s197_s10 }
  0x2b   :  { %230 = vmatprep.subr.mxu0 %v363_v0  ;;  %p316_p3 = scmp.lt.s32.totalorder %s314_s12, %s310_s11 }
  0x2c   :  { %231 = vmatpush3.msra.mxu0 %v61_v3 }
  0x2d   :  { %232 = vmatprep.subr.mxu0 %v363_v0  ;;  %p317_p4 = por %p316_p3, %p315_p2 }
  0x2e   :  { %233 = vmatpush3.msra.mxu0 %v60_v4 }
  0x2f   :  { %235 = vmatmul.mubr.msk.f32.vlgmr.msra.gmra.mxu0 %vm64_vm1, %v59_v5  ;;  %p318_p5 = pnand %p317_p4, %p311_p1 }
  0xef   :  { %v134_v7 = vpop.f32.mrf.mxu0 }
  0xf0   :  { %v139_v8 = vmul.f32 %v138_v6, %v134_v7 }
  0xf1   :  { %v236_v9 = vpop.f32.mrf.mxu0 }
  0xf2   :  { %v140_v10 = vsel %vm64_vm1, %v139_v8, 0.0 }
  0xf3   :  { %141 = vadd.xlane.f32.xlu0 %v140_v10 }
 0x17c   :  { %v142_v16 = vpop.xlane.xlu0 %141 }
 0x17d   :  { %v145_v17 = vadd.f32 %v144_v14, %v142_v16 }
 0x17f   :  { %v152_v18 = vrot.slane %v145_v17, %v151_v15 }
 0x181   :  { %v160_v19 = vsel %vm159_vm3, %v152_v18, 0.0  ;;  %155 = vst.msk [vmem:[#allocation9] sm:$0x1] %vm154_vm2, %v152_v18 }
 0x182   :  { %v162_v20 = vsel %vm154_vm2, %v160_v19, 0.0  ;;  %v175_v21 = vmul.f32 %v160_v19, %v160_v19 }
 0x183   :  { %163 = vadd.xlane.f32.xlu0 %v162_v20 }
 0x184   :  { %v176_v22 = vsel %vm154_vm2, %v175_v21, 0.0 }
 0x185   :  { %177 = vadd.xlane.f32.xlu1 %v176_v22 }
 0x186   :  { %321 = shalt.err (!%p318_p5)
}
 0x187   :  { %199 = dma.vmem_to_hbm [thread:$0]  %s197_s10, 16, %s419_s4, [#allocation5]   ;;  %vm161_vm4 = vcmp.eq.s32.totalorder %v148_v12, 0  ;;  %vm174_vm5 = vcmp.eq.s32.totalorder %v148_v12, 1 }
 0x188   :  { %s366_s15 = smov [#allocation10]  }
 0x189   :  { %s206_s16 = sshll.u32 %s366_s15, 4  ;;  %s207_s16 = int_to_ptr.vmem [resolvable:$true] %s206_s16 }
 0x18a   :  { %s330_s17 = scalar_lea.vmem %s207_s16, 16  ;;  %s334_s18 = scalar_lea.vmem %s207_s16, 32 }
 0x18b   :  { %p331_p6 = scmp.ne.s32.totalorder %s207_s16, %s330_s17  ;;  %p335_p7 = scmp.lt.s32.totalorder %s207_s16, %s207_s16 }
 0x18c   :  { %p336_p8 = scmp.lt.s32.totalorder %s334_s18, %s330_s17 }
 0x18e   :  { %p337_p9 = por %p336_p8, %p335_p7 }
 0x190   :  { %p338_p10 = pnand %p337_p9, %p331_p6 }
 0x20c   :  { %v164_v23 = vpop.xlane.xlu0 %163 }
 0x20d   :  { %v165_v24 = vrot.slane %v164_v23, 4 }
 0x20e   :  { %v178_v25 = vpop.xlane.xlu1 %177 }
 0x20f   :  { %v166_v26 = vadd.f32 %v165_v24, %v164_v23  ;;  %v179_v27 = vrot.slane %v178_v25, 4 }
 0x211   :  { %v167_v28 = vrot.slane %v166_v26, 2  ;;  %v180_v29 = vadd.f32 %v179_v27, %v178_v25 }
 0x213   :  { %v181_v30 = vrot.slane %v180_v29, 2  ;;  %v168_v31 = vadd.f32 %v167_v28, %v166_v26 }
 0x215   :  { %v182_v32 = vadd.f32 %v181_v30, %v180_v29  ;;  %v169_v33 = vrot.slane %v168_v31, 1 }
 0x217   :  { %v170_v34 = vadd.f32 %v169_v33, %v168_v31  ;;  %v183_v35 = vrot.slane %v182_v32, 1 }
 0x219   :  { %237 = vpush %v170_v34  ;;  %v184_v36 = vadd.f32 %v183_v35, %v182_v32 }
 0x21b   :  { %239 = vpush %v184_v36 }
 0x24a   :  { %s238_s14 = spop %237 }
 0x24b   :  { %v172_v37 = vstv %s238_s14 }
 0x24c   :  { %s240_s4 = spop %239  ;;  %v173_v39 = vsel %vm161_vm4, %v172_v37, 0.0 }
 0x24d   :  { %v186_v38 = vstv %s240_s4 }
 0x24e   :  { %v187_v40 = vsel %vm174_vm5, %v186_v38, 0.0 }
 0x24f   :  { %v188_v41 = vadd.f32 %v187_v40, %v173_v39 }
 0x251   :  { %189 = vst [vmem:[#allocation10] sm:$0x1] %v188_v41 }
 0x252   :  { %341 = shalt.err (!%p338_p10)
}
 0x253   :  { %209 = dma.vmem_to_hbm [thread:$0]  %s207_s16, 16, %s420_s5, [#allocation11]  }
 0x254   :  { %354 = dma.done.wait [#allocation5], 16  }
 0x255   :  { %355 = vsyncadd [#allocation5], 4294967280 }
 0x256   :  { %356 = dma.done.wait [#allocation11], 16  }
 0x257   :  { %357 = vsyncadd [#allocation11], 4294967280 }
 0x258   :  { %216 = vsyncpa [#allocation4], 1 }
 0x259   :  { %217 = vsyncpa [#allocation7], 1 }
 0x25a   :  { %218 = vsyncpa [#allocation5], 1 }
 0x25b   :  { %219 = vsyncpa [#allocation11], 1 }

</bundles_post_ra>
